<compile_context>
chip_gen: v7x
topology: tpu7x:2x2x1
jax: 0.10.0
libtpu: 0.0.40
codegen_flags: <defaults>
</compile_context>

<pallas_src>
import jax
import jax.numpy as jnp
from jax import lax
from jax.experimental import pallas as pl
from jax.experimental.pallas import tpu as pltpu


def _round_up(x, m):
    return ((x + m - 1) // m) * m


# ----------------------------------------------------------------------------
# Fused kernel: embedding gather + hoisted input projection + LSTM recurrence
#               + final FC + sigmoid
# ----------------------------------------------------------------------------
def _make_kernel(B, T, Bp, H):
    def kernel(ids_ref, emb_ref, wih_ref, whh_ref, b_ref, fcw_ref, fcb_ref,
               out_ref, x_scr):
        # ids_ref : (B*T,) int32, SMEM (scalar prefetch), row-major over (B, T)
        # emb_ref : (V, E)   f32 embedding table (VMEM)
        # wih_ref : (E, 4H)  f32, gate order [i|f|g|o] along lanes
        # whh_ref : (H, 4H)  f32
        # b_ref   : (1, 4H)  f32 (b_ih + b_hh)
        # fcw_ref : (H, Op)  f32 (col 0 real, remaining lanes zero)
        # fcb_ref : (1, Op)  f32
        # out_ref : (Bp, Op) f32
        # x_scr   : (T*Bp, E) f32 scratch, row r = t*Bp + b
        H4 = whh_ref.shape[1]

        # ---- Fused embedding gather (padded batch rows stay zero).
        x_scr[...] = jnp.zeros_like(x_scr)
        for t in range(T):
            for b in range(B):
                tok = ids_ref[b * T + t]                       # SMEM scalar
                x_scr[pl.ds(t * Bp + b, 1), :] = emb_ref[pl.ds(tok, 1), :]

        # ---- Hoisted input projection: ONE MXU matmul for every timestep.
        gx = jnp.dot(x_scr[...], wih_ref[...],
                     preferred_element_type=jnp.float32) + b_ref[...]   # (T*Bp, 4H)

        # ---- Per-lane masks so a single tanh covers all four gates:
        #      i/f/o lanes: sigmoid(x) = 0.5 * tanh(0.5 * x) + 0.5
        #      g lanes    : tanh(x)
        lane = lax.broadcasted_iota(jnp.int32, (Bp, H4), 1)
        is_g = (lane >= 2 * H) & (lane < 3 * H)
        scale = jnp.where(is_g, 1.0, 0.5).astype(jnp.float32)   # pre & post scale
        shift = jnp.where(is_g, 0.0, 0.5).astype(jnp.float32)   # post shift

        # ---- Recurrence.  Statically unrolled (T is small); h/c are 1 vreg each and
        #      w_hh is re-read from VMEM per step, so no spill pressure.
        h = jnp.zeros((Bp, H), jnp.float32)
        c = jnp.zeros((Bp, H), jnp.float32)
        for t in range(T):
            gates = gx[t * Bp:(t + 1) * Bp, :] + jnp.dot(
                h, whh_ref[...], preferred_element_type=jnp.float32)    # (Bp, 4H)
            act = jnp.tanh(gates * scale) * scale + shift
            i_g = act[:, 0 * H:1 * H]
            f_g = act[:, 1 * H:2 * H]
            g_g = act[:, 2 * H:3 * H]
            o_g = act[:, 3 * H:4 * H]
            c = f_g * c + i_g * g_g
            h = o_g * jnp.tanh(c)

        # ---- Final FC + sigmoid into a lane-dense (Bp, Op) tile.
        logits = jnp.dot(h, fcw_ref[...],
                         preferred_element_type=jnp.float32) + fcb_ref[...]
        out_ref[...] = jax.nn.sigmoid(logits)

    return kernel


def _vmem_spec():
    return pl.BlockSpec(memory_space=pltpu.MemorySpace.VMEM)


def lstm_fc_pallas(input_ids, emb, wih, whh, b, fcw, fcb):
    """input_ids: (B, T) int32.  Returns (Bp, Op) f32 (batch/lane padded)."""
    B, T = input_ids.shape
    V, E = emb.shape
    H, H4 = whh.shape
    Op = fcw.shape[1]
    Bp = _round_up(max(B, 8), 8)

    ids_flat = input_ids.reshape(B * T).astype(jnp.int32)

    flops = 2 * T * Bp * E * H4 + 2 * T * Bp * H * H4 + 2 * Bp * H * Op
    transcendentals = 2 * T * Bp * H4 + Bp * Op
    bytes_accessed = 4 * (B * T + V * E + E * H4 + H * H4 + H4
                          + H * Op + Op + Bp * Op)

    return pl.pallas_call(
        _make_kernel(B, T, Bp, H),
        out_shape=jax.ShapeDtypeStruct((Bp, Op), jnp.float32),
        grid_spec=pltpu.PrefetchScalarGridSpec(
            num_scalar_prefetch=1,
            grid=(1,),
            in_specs=[_vmem_spec() for _ in range(6)],
            out_specs=_vmem_spec(),
            scratch_shapes=[pltpu.VMEM((T * Bp, E), jnp.float32)],
        ),
        compiler_params=pltpu.CompilerParams(
            dimension_semantics=("arbitrary",)),
        cost_estimate=pl.CostEstimate(
            flops=flops, transcendentals=transcendentals,
            bytes_accessed=bytes_accessed),
    )(ids_flat, emb, wih, whh, b, fcw, fcb)


# ----------------------------------------------------------------------------
# Module-level wrapper (only slices the padded output; everything else is fused)
# ----------------------------------------------------------------------------
def score_predictor_forward(params, input_ids, attention_mask):
    # attention_mask is accepted but unused, matching the PyTorch forward.
    # (Padding tokens still advance the LSTM state, exactly as in the reference.)
    del attention_mask
    B = input_ids.shape[0]
    out_p = lstm_fc_pallas(input_ids, params["embedding"],
                           params["wih_p"], params["whh_p"], params["b_p"],
                           params["fcw_p"], params["fcb_p"])
    return out_p[:B, :params["output_dim"]]


# ----------------------------------------------------------------------------
# Deterministic parameter init (synthetic; matches the module __init__ shapes)
# plus packed kernel layouts (no zero-padding of LSTM weights).
# ----------------------------------------------------------------------------
def init_params(key, vocab_size, embedding_dim, hidden_dim, output_dim):
    k1, k2, k3, k4, k5, k6, k7 = jax.random.split(key, 7)
    scale = 1.0 / jnp.sqrt(hidden_dim)

    embedding = 0.1 * jax.random.normal(k1, (vocab_size, embedding_dim), jnp.float32)
    embedding = embedding.at[0].set(0.0)  # padding_idx=0

    w_ih = jax.random.uniform(k2, (4 * hidden_dim, embedding_dim), jnp.float32, -scale, scale)
    w_hh = jax.random.uniform(k3, (4 * hidden_dim, hidden_dim), jnp.float32, -scale, scale)
    b_ih = jax.random.uniform(k4, (4 * hidden_dim,), jnp.float32, -scale, scale)
    b_hh = jax.random.uniform(k5, (4 * hidden_dim,), jnp.float32, -scale, scale)
    fc_w = jax.random.uniform(k6, (output_dim, hidden_dim), jnp.float32, -scale, scale)
    fc_b = jax.random.uniform(k7, (output_dim,), jnp.float32, -scale, scale)

    H, O = hidden_dim, output_dim
    Op = _round_up(O, 128)   # lane-dense FC output tile (tiny; keeps stores unmasked)

    # Packed kernel layouts: transposed, PyTorch gate order [i|f|g|o] along lanes.
    wih_p = w_ih.T                                                    # (E, 4H)
    whh_p = w_hh.T                                                    # (H, 4H)
    b_p = (b_ih + b_hh).reshape(1, 4 * H)                             # (1, 4H)
    fcw_p = jnp.zeros((H, Op), jnp.float32).at[:, :O].set(fc_w.T)     # (H, Op)
    fcb_p = jnp.zeros((1, Op), jnp.float32).at[0, :O].set(fc_b)       # (1, Op)

    return {
        # raw (for the pure-JAX reference)
        "embedding": embedding,
        "w_ih": w_ih, "w_hh": w_hh, "b": b_ih + b_hh, "fc_w": fc_w, "fc_b": fc_b,
        # packed kernel layouts
        "wih_p": wih_p, "whh_p": whh_p, "b_p": b_p, "fcw_p": fcw_p, "fcb_p": fcb_p,
        # static dims
        "hidden_dim": hidden_dim, "output_dim": output_dim,
    }


# ----------------------------------------------------------------------------
# Pure-JAX reference (for correctness check)
# ----------------------------------------------------------------------------
def score_predictor_reference(params, input_ids, attention_mask):
    del attention_mask
    emb = jnp.take(params["embedding"], input_ids, axis=0)  # (B, T, E)
    B, T, E = emb.shape
    H = params["hidden_dim"]
    w_ih_t = params["w_ih"].T           # (E, 4H)
    w_hh_t = params["w_hh"].T           # (H, 4H)
    b = params["b"].reshape(1, 4 * H)

    def step(carry, x_t):
        h, c = carry
        gates = x_t @ w_ih_t + h @ w_hh_t + b
        i_g = jax.nn.sigmoid(gates[:, 0 * H:1 * H])
        f_g = jax.nn.sigmoid(gates[:, 1 * H:2 * H])
        g_g = jnp.tanh(gates[:, 2 * H:3 * H])
        o_g = jax.nn.sigmoid(gates[:, 3 * H:4 * H])
        c_new = f_g * c + i_g * g_g
        h_new = o_g * jnp.tanh(c_new)
        return (h_new, c_new), None

    h0 = jnp.zeros((B, H), jnp.float32)
    c0 = jnp.zeros((B, H), jnp.float32)
    (h_last, _), _ = lax.scan(step, (h0, c0), jnp.transpose(emb, (1, 0, 2)))
    return jax.nn.sigmoid(h_last @ params["fc_w"].T + params["fc_b"].reshape(1, -1))


if __name__ == "__main__":
    # Small shapes consistent with the module's forward (4*HID = 128 packs the gates
    # into exactly one lane tile).
    VOCAB, EMB, HID, OUT = 50, 32, 32, 1
    BATCH, SEQ = 2, 8

    key = jax.random.PRNGKey(0)
    k_ids, k_params = jax.random.split(key)

    input_ids = jax.random.randint(k_ids, (BATCH, SEQ), 0, VOCAB, dtype=jnp.int32)
    attention_mask = jnp.ones((BATCH, SEQ), jnp.int32)  # unused (matches PyTorch forward)

    params = init_params(k_params, VOCAB, EMB, HID, OUT)

    out = jax.block_until_ready(score_predictor_forward(params, input_ids, attention_mask))
    ref = jax.block_until_ready(score_predictor_reference(params, input_ids, attention_mask))

    assert out.shape == (BATCH, OUT), out.shape
    assert jnp.allclose(out, ref, atol=2e-3, rtol=2e-3), (out, ref)

    print("KERNEL_OK")
</pallas_src>

<mosaic_0001>
module attributes {stable_mosaic.version = 11 : i64} {
  func.func @kernel(%arg0: i32, %arg1: memref<16xi32, #tpu.memory_space<smem>>, %arg2: memref<50x32xf32, #tpu.memory_space<vmem>>, %arg3: memref<32x128xf32, #tpu.memory_space<vmem>>, %arg4: memref<32x128xf32, #tpu.memory_space<vmem>>, %arg5: memref<1x128xf32, #tpu.memory_space<vmem>>, %arg6: memref<32x128xf32, #tpu.memory_space<vmem>>, %arg7: memref<1x128xf32, #tpu.memory_space<vmem>>, %arg8: memref<8x128xf32, #tpu.memory_space<vmem>>, %arg9: memref<64x32xf32, #tpu.memory_space<vmem>>) attributes {dimension_semantics = [#tpu.dimension_semantics<arbitrary>], iteration_bounds = array<i64: 1>, scalar_prefetch = 1 : i64, scratch_operands = 1 : i64, tpu.core_type = #tpu.core_type<tc>, window_params = [{pipeline_mode = #tpu.pipeline_mode<synchronous>, transform_indices = @transform_0, window_bounds = array<i64: 50, 32>}, {pipeline_mode = #tpu.pipeline_mode<synchronous>, transform_indices = @transform_1, window_bounds = array<i64: 32, 128>}, {pipeline_mode = #tpu.pipeline_mode<synchronous>, transform_indices = @transform_2, window_bounds = array<i64: 32, 128>}, {pipeline_mode = #tpu.pipeline_mode<synchronous>, transform_indices = @transform_3, window_bounds = array<i64: 1, 128>}, {pipeline_mode = #tpu.pipeline_mode<synchronous>, transform_indices = @transform_4, window_bounds = array<i64: 32, 128>}, {pipeline_mode = #tpu.pipeline_mode<synchronous>, transform_indices = @transform_5, window_bounds = array<i64: 1, 128>}, {pipeline_mode = #tpu.pipeline_mode<synchronous>, transform_indices = @transform_6, window_bounds = array<i64: 8, 128>}]} {
    %cst = arith.constant 0.000000e+00 : f32
    %0 = vector.broadcast %cst : f32 to vector<64x32xf32>
    %c0 = arith.constant 0 : index
    %c0_0 = arith.constant 0 : index
    %1 = vector.load %arg9[%c0, %c0_0] : memref<64x32xf32, #tpu.memory_space<vmem>>, vector<64x32xf32>
    tpu.vector_store %arg9[%c0, %c0_0], %0 {strides = array<i32>} : memref<64x32xf32, #tpu.memory_space<vmem>>, vector<64x32xf32>,
    %c0_1 = arith.constant 0 : index
    %2 = memref.load %arg1[%c0_1] : memref<16xi32, #tpu.memory_space<smem>>
    %3 = arith.index_cast %2 : i32 to index
    %c0_2 = arith.constant 0 : index
    %4 = vector.load %arg2[%3, %c0_2] : memref<50x32xf32, #tpu.memory_space<vmem>>, vector<1x32xf32>
    %c0_3 = arith.constant 0 : index
    %c0_4 = arith.constant 0 : index
    %5 = vector.load %arg9[%c0_3, %c0_4] : memref<64x32xf32, #tpu.memory_space<vmem>>, vector<1x32xf32>
    tpu.vector_store %arg9[%c0_3, %c0_4], %4 {strides = array<i32>} : memref<64x32xf32, #tpu.memory_space<vmem>>, vector<1x32xf32>,
    %c8 = arith.constant 8 : index
    %6 = memref.load %arg1[%c8] : memref<16xi32, #tpu.memory_space<smem>>
    %7 = arith.index_cast %6 : i32 to index
    %c0_5 = arith.constant 0 : index
    %8 = vector.load %arg2[%7, %c0_5] : memref<50x32xf32, #tpu.memory_space<vmem>>, vector<1x32xf32>
    %c1 = arith.constant 1 : index
    %c0_6 = arith.constant 0 : index
    %9 = vector.load %arg9[%c1, %c0_6] : memref<64x32xf32, #tpu.memory_space<vmem>>, vector<1x32xf32>
    tpu.vector_store %arg9[%c1, %c0_6], %8 {strides = array<i32>} : memref<64x32xf32, #tpu.memory_space<vmem>>, vector<1x32xf32>,
    %c1_7 = arith.constant 1 : index
    %10 = memref.load %arg1[%c1_7] : memref<16xi32, #tpu.memory_space<smem>>
    %11 = arith.index_cast %10 : i32 to index
    %c0_8 = arith.constant 0 : index
    %12 = vector.load %arg2[%11, %c0_8] : memref<50x32xf32, #tpu.memory_space<vmem>>, vector<1x32xf32>
    %c8_9 = arith.constant 8 : index
    %c0_10 = arith.constant 0 : index
    %13 = vector.load %arg9[%c8_9, %c0_10] : memref<64x32xf32, #tpu.memory_space<vmem>>, vector<1x32xf32>
    tpu.vector_store %arg9[%c8_9, %c0_10], %12 {strides = array<i32>} : memref<64x32xf32, #tpu.memory_space<vmem>>, vector<1x32xf32>,
    %c9 = arith.constant 9 : index
    %14 = memref.load %arg1[%c9] : memref<16xi32, #tpu.memory_space<smem>>
    %15 = arith.index_cast %14 : i32 to index
    %c0_11 = arith.constant 0 : index
    %16 = vector.load %arg2[%15, %c0_11] : memref<50x32xf32, #tpu.memory_space<vmem>>, vector<1x32xf32>
    %c9_12 = arith.constant 9 : index
    %c0_13 = arith.constant 0 : index
    %17 = vector.load %arg9[%c9_12, %c0_13] : memref<64x32xf32, #tpu.memory_space<vmem>>, vector<1x32xf32>
    tpu.vector_store %arg9[%c9_12, %c0_13], %16 {strides = array<i32>} : memref<64x32xf32, #tpu.memory_space<vmem>>, vector<1x32xf32>,
    %c2 = arith.constant 2 : index
    %18 = memref.load %arg1[%c2] : memref<16xi32, #tpu.memory_space<smem>>
    %19 = arith.index_cast %18 : i32 to index
    %c0_14 = arith.constant 0 : index
    %20 = vector.load %arg2[%19, %c0_14] : memref<50x32xf32, #tpu.memory_space<vmem>>, vector<1x32xf32>
    %c16 = arith.constant 16 : index
    %c0_15 = arith.constant 0 : index
    %21 = vector.load %arg9[%c16, %c0_15] : memref<64x32xf32, #tpu.memory_space<vmem>>, vector<1x32xf32>
    tpu.vector_store %arg9[%c16, %c0_15], %20 {strides = array<i32>} : memref<64x32xf32, #tpu.memory_space<vmem>>, vector<1x32xf32>,
    %c10 = arith.constant 10 : index
    %22 = memref.load %arg1[%c10] : memref<16xi32, #tpu.memory_space<smem>>
    %23 = arith.index_cast %22 : i32 to index
    %c0_16 = arith.constant 0 : index
    %24 = vector.load %arg2[%23, %c0_16] : memref<50x32xf32, #tpu.memory_space<vmem>>, vector<1x32xf32>
    %c17 = arith.constant 17 : index
    %c0_17 = arith.constant 0 : index
    %25 = vector.load %arg9[%c17, %c0_17] : memref<64x32xf32, #tpu.memory_space<vmem>>, vector<1x32xf32>
    tpu.vector_store %arg9[%c17, %c0_17], %24 {strides = array<i32>} : memref<64x32xf32, #tpu.memory_space<vmem>>, vector<1x32xf32>,
    %c3 = arith.constant 3 : index
    %26 = memref.load %arg1[%c3] : memref<16xi32, #tpu.memory_space<smem>>
    %27 = arith.index_cast %26 : i32 to index
    %c0_18 = arith.constant 0 : index
    %28 = vector.load %arg2[%27, %c0_18] : memref<50x32xf32, #tpu.memory_space<vmem>>, vector<1x32xf32>
    %c24 = arith.constant 24 : index
    %c0_19 = arith.constant 0 : index
    %29 = vector.load %arg9[%c24, %c0_19] : memref<64x32xf32, #tpu.memory_space<vmem>>, vector<1x32xf32>
    tpu.vector_store %arg9[%c24, %c0_19], %28 {strides = array<i32>} : memref<64x32xf32, #tpu.memory_space<vmem>>, vector<1x32xf32>,
    %c11 = arith.constant 11 : index
    %30 = memref.load %arg1[%c11] : memref<16xi32, #tpu.memory_space<smem>>
    %31 = arith.index_cast %30 : i32 to index
    %c0_20 = arith.constant 0 : index
    %32 = vector.load %arg2[%31, %c0_20] : memref<50x32xf32, #tpu.memory_space<vmem>>, vector<1x32xf32>
    %c25 = arith.constant 25 : index
    %c0_21 = arith.constant 0 : index
    %33 = vector.load %arg9[%c25, %c0_21] : memref<64x32xf32, #tpu.memory_space<vmem>>, vector<1x32xf32>
    tpu.vector_store %arg9[%c25, %c0_21], %32 {strides = array<i32>} : memref<64x32xf32, #tpu.memory_space<vmem>>, vector<1x32xf32>,
    %c4 = arith.constant 4 : index
    %34 = memref.load %arg1[%c4] : memref<16xi32, #tpu.memory_space<smem>>
    %35 = arith.index_cast %34 : i32 to index
    %c0_22 = arith.constant 0 : index
    %36 = vector.load %arg2[%35, %c0_22] : memref<50x32xf32, #tpu.memory_space<vmem>>, vector<1x32xf32>
    %c32 = arith.constant 32 : index
    %c0_23 = arith.constant 0 : index
    %37 = vector.load %arg9[%c32, %c0_23] : memref<64x32xf32, #tpu.memory_space<vmem>>, vector<1x32xf32>
    tpu.vector_store %arg9[%c32, %c0_23], %36 {strides = array<i32>} : memref<64x32xf32, #tpu.memory_space<vmem>>, vector<1x32xf32>,
    %c12 = arith.constant 12 : index
    %38 = memref.load %arg1[%c12] : memref<16xi32, #tpu.memory_space<smem>>
    %39 = arith.index_cast %38 : i32 to index
    %c0_24 = arith.constant 0 : index
    %40 = vector.load %arg2[%39, %c0_24] : memref<50x32xf32, #tpu.memory_space<vmem>>, vector<1x32xf32>
    %c33 = arith.constant 33 : index
    %c0_25 = arith.constant 0 : index
    %41 = vector.load %arg9[%c33, %c0_25] : memref<64x32xf32, #tpu.memory_space<vmem>>, vector<1x32xf32>
    tpu.vector_store %arg9[%c33, %c0_25], %40 {strides = array<i32>} : memref<64x32xf32, #tpu.memory_space<vmem>>, vector<1x32xf32>,
    %c5 = arith.constant 5 : index
    %42 = memref.load %arg1[%c5] : memref<16xi32, #tpu.memory_space<smem>>
    %43 = arith.index_cast %42 : i32 to index
    %c0_26 = arith.constant 0 : index
    %44 = vector.load %arg2[%43, %c0_26] : memref<50x32xf32, #tpu.memory_space<vmem>>, vector<1x32xf32>
    %c40 = arith.constant 40 : index
    %c0_27 = arith.constant 0 : index
    %45 = vector.load %arg9[%c40, %c0_27] : memref<64x32xf32, #tpu.memory_space<vmem>>, vector<1x32xf32>
    tpu.vector_store %arg9[%c40, %c0_27], %44 {strides = array<i32>} : memref<64x32xf32, #tpu.memory_space<vmem>>, vector<1x32xf32>,
    %c13 = arith.constant 13 : index
    %46 = memref.load %arg1[%c13] : memref<16xi32, #tpu.memory_space<smem>>
    %47 = arith.index_cast %46 : i32 to index
    %c0_28 = arith.constant 0 : index
    %48 = vector.load %arg2[%47, %c0_28] : memref<50x32xf32, #tpu.memory_space<vmem>>, vector<1x32xf32>
    %c41 = arith.constant 41 : index
    %c0_29 = arith.constant 0 : index
    %49 = vector.load %arg9[%c41, %c0_29] : memref<64x32xf32, #tpu.memory_space<vmem>>, vector<1x32xf32>
    tpu.vector_store %arg9[%c41, %c0_29], %48 {strides = array<i32>} : memref<64x32xf32, #tpu.memory_space<vmem>>, vector<1x32xf32>,
    %c6 = arith.constant 6 : index
    %50 = memref.load %arg1[%c6] : memref<16xi32, #tpu.memory_space<smem>>
    %51 = arith.index_cast %50 : i32 to index
    %c0_30 = arith.constant 0 : index
    %52 = vector.load %arg2[%51, %c0_30] : memref<50x32xf32, #tpu.memory_space<vmem>>, vector<1x32xf32>
    %c48 = arith.constant 48 : index
    %c0_31 = arith.constant 0 : index
    %53 = vector.load %arg9[%c48, %c0_31] : memref<64x32xf32, #tpu.memory_space<vmem>>, vector<1x32xf32>
    tpu.vector_store %arg9[%c48, %c0_31], %52 {strides = array<i32>} : memref<64x32xf32, #tpu.memory_space<vmem>>, vector<1x32xf32>,
    %c14 = arith.constant 14 : index
    %54 = memref.load %arg1[%c14] : memref<16xi32, #tpu.memory_space<smem>>
    %55 = arith.index_cast %54 : i32 to index
    %c0_32 = arith.constant 0 : index
    %56 = vector.load %arg2[%55, %c0_32] : memref<50x32xf32, #tpu.memory_space<vmem>>, vector<1x32xf32>
    %c49 = arith.constant 49 : index
    %c0_33 = arith.constant 0 : index
    %57 = vector.load %arg9[%c49, %c0_33] : memref<64x32xf32, #tpu.memory_space<vmem>>, vector<1x32xf32>
    tpu.vector_store %arg9[%c49, %c0_33], %56 {strides = array<i32>} : memref<64x32xf32, #tpu.memory_space<vmem>>, vector<1x32xf32>,
    %c7 = arith.constant 7 : index
    %58 = memref.load %arg1[%c7] : memref<16xi32, #tpu.memory_space<smem>>
    %59 = arith.index_cast %58 : i32 to index
    %c0_34 = arith.constant 0 : index
    %60 = vector.load %arg2[%59, %c0_34] : memref<50x32xf32, #tpu.memory_space<vmem>>, vector<1x32xf32>
    %c56 = arith.constant 56 : index
    %c0_35 = arith.constant 0 : index
    %61 = vector.load %arg9[%c56, %c0_35] : memref<64x32xf32, #tpu.memory_space<vmem>>, vector<1x32xf32>
    tpu.vector_store %arg9[%c56, %c0_35], %60 {strides = array<i32>} : memref<64x32xf32, #tpu.memory_space<vmem>>, vector<1x32xf32>,
    %c15 = arith.constant 15 : index
    %62 = memref.load %arg1[%c15] : memref<16xi32, #tpu.memory_space<smem>>
    %63 = arith.index_cast %62 : i32 to index
    %c0_36 = arith.constant 0 : index
    %64 = vector.load %arg2[%63, %c0_36] : memref<50x32xf32, #tpu.memory_space<vmem>>, vector<1x32xf32>
    %c57 = arith.constant 57 : index
    %c0_37 = arith.constant 0 : index
    %65 = vector.load %arg9[%c57, %c0_37] : memref<64x32xf32, #tpu.memory_space<vmem>>, vector<1x32xf32>
    tpu.vector_store %arg9[%c57, %c0_37], %64 {strides = array<i32>} : memref<64x32xf32, #tpu.memory_space<vmem>>, vector<1x32xf32>,
    %c0_38 = arith.constant 0 : index
    %c0_39 = arith.constant 0 : index
    %66 = vector.load %arg9[%c0_38, %c0_39] : memref<64x32xf32, #tpu.memory_space<vmem>>, vector<64x32xf32>
    %c0_40 = arith.constant 0 : index
    %c0_41 = arith.constant 0 : index
    %67 = vector.load %arg3[%c0_40, %c0_41] : memref<32x128xf32, #tpu.memory_space<vmem>>, vector<32x128xf32>
    %cst_42 = arith.constant dense<0.000000e+00> : vector<64x128xf32>
    %68 = tpu.matmul %66, %67, %cst_42 {dimension_numbers = #tpu.dot_dimension_numbers<[1], [0], [0], [1], [0, 0, 1, 1], [], []>} : vector<64x32xf32>, vector<32x128xf32>, vector<64x128xf32> -> vector<64x128xf32>
    %c0_43 = arith.constant 0 : index
    %c0_44 = arith.constant 0 : index
    %69 = vector.load %arg5[%c0_43, %c0_44] : memref<1x128xf32, #tpu.memory_space<vmem>>, vector<1x128xf32>
    %70 = vector.broadcast %69 : vector<1x128xf32> to vector<64x128xf32>
    %71 = arith.addf %68, %70 : vector<64x128xf32>
    %72 = tpu.iota {dimensions = array<i32: 1>} : vector<8x128xi32>
    %c64_i32 = arith.constant 64 : i32
    %73 = vector.broadcast %c64_i32 : i32 to vector<8x128xi32>
    %74 = arith.cmpi sge, %72, %73 : vector<8x128xi32>
    %c96_i32 = arith.constant 96 : i32
    %75 = vector.broadcast %c96_i32 : i32 to vector<8x128xi32>
    %76 = arith.cmpi slt, %72, %75 : vector<8x128xi32>
    %77 = arith.andi %74, %76 : vector<8x128xi1>
    %cst_45 = arith.constant 1.000000e+00 : f32
    %cst_46 = arith.constant 5.000000e-01 : f32
    %78 = vector.broadcast %cst_45 : f32 to vector<8x128xf32>
    %79 = vector.broadcast %cst_46 : f32 to vector<8x128xf32>
    %80 = arith.select %77, %78, %79 : vector<8x128xi1>, vector<8x128xf32>
    %cst_47 = arith.constant 0.000000e+00 : f32
    %cst_48 = arith.constant 5.000000e-01 : f32
    %81 = vector.broadcast %cst_47 : f32 to vector<8x128xf32>
    %82 = vector.broadcast %cst_48 : f32 to vector<8x128xf32>
    %83 = arith.select %77, %81, %82 : vector<8x128xi1>, vector<8x128xf32>
    %cst_49 = arith.constant 0.000000e+00 : f32
    %84 = vector.broadcast %cst_49 : f32 to vector<8x32xf32>
    %cst_50 = arith.constant 0.000000e+00 : f32
    %85 = vector.broadcast %cst_50 : f32 to vector<8x32xf32>
    %86 = vector.extract_strided_slice %71 {offsets = [0, 0], sizes = [8, 128], strides = [1, 1]} : vector<64x128xf32> to vector<8x128xf32>
    %c0_51 = arith.constant 0 : index
    %c0_52 = arith.constant 0 : index
    %87 = vector.load %arg4[%c0_51, %c0_52] : memref<32x128xf32, #tpu.memory_space<vmem>>, vector<32x128xf32>
    %cst_53 = arith.constant dense<0.000000e+00> : vector<8x128xf32>
    %88 = tpu.matmul %84, %87, %cst_53 {dimension_numbers = #tpu.dot_dimension_numbers<[1], [0], [0], [1], [0, 0, 1, 1], [], []>} : vector<8x32xf32>, vector<32x128xf32>, vector<8x128xf32> -> vector<8x128xf32>
    %89 = arith.addf %86, %88 : vector<8x128xf32>
    %90 = arith.mulf %89, %80 : vector<8x128xf32>
    %91 = math.tanh %90 : vector<8x128xf32>
    %92 = arith.mulf %91, %80 : vector<8x128xf32>
    %93 = arith.addf %92, %83 : vector<8x128xf32>
    %94 = vector.extract_strided_slice %93 {offsets = [0, 0], sizes = [8, 32], strides = [1, 1]} : vector<8x128xf32> to vector<8x32xf32>
    %95 = vector.extract_strided_slice %93 {offsets = [0, 32], sizes = [8, 32], strides = [1, 1]} : vector<8x128xf32> to vector<8x32xf32>
    %96 = vector.extract_strided_slice %93 {offsets = [0, 64], sizes = [8, 32], strides = [1, 1]} : vector<8x128xf32> to vector<8x32xf32>
    %97 = vector.extract_strided_slice %93 {offsets = [0, 96], sizes = [8, 32], strides = [1, 1]} : vector<8x128xf32> to vector<8x32xf32>
    %98 = arith.mulf %95, %85 : vector<8x32xf32>
    %99 = arith.mulf %94, %96 : vector<8x32xf32>
    %100 = arith.addf %98, %99 : vector<8x32xf32>
    %101 = math.tanh %100 : vector<8x32xf32>
    %102 = arith.mulf %97, %101 : vector<8x32xf32>
    %103 = vector.extract_strided_slice %71 {offsets = [8, 0], sizes = [8, 128], strides = [1, 1]} : vector<64x128xf32> to vector<8x128xf32>
    %c0_54 = arith.constant 0 : index
    %c0_55 = arith.constant 0 : index
    %104 = vector.load %arg4[%c0_54, %c0_55] : memref<32x128xf32, #tpu.memory_space<vmem>>, vector<32x128xf32>
    %cst_56 = arith.constant dense<0.000000e+00> : vector<8x128xf32>
    %105 = tpu.matmul %102, %104, %cst_56 {dimension_numbers = #tpu.dot_dimension_numbers<[1], [0], [0], [1], [0, 0, 1, 1], [], []>} : vector<8x32xf32>, vector<32x128xf32>, vector<8x128xf32> -> vector<8x128xf32>
    %106 = arith.addf %103, %105 : vector<8x128xf32>
    %107 = arith.mulf %106, %80 : vector<8x128xf32>
    %108 = math.tanh %107 : vector<8x128xf32>
    %109 = arith.mulf %108, %80 : vector<8x128xf32>
    %110 = arith.addf %109, %83 : vector<8x128xf32>
    %111 = vector.extract_strided_slice %110 {offsets = [0, 0], sizes = [8, 32], strides = [1, 1]} : vector<8x128xf32> to vector<8x32xf32>
    %112 = vector.extract_strided_slice %110 {offsets = [0, 32], sizes = [8, 32], strides = [1, 1]} : vector<8x128xf32> to vector<8x32xf32>
    %113 = vector.extract_strided_slice %110 {offsets = [0, 64], sizes = [8, 32], strides = [1, 1]} : vector<8x128xf32> to vector<8x32xf32>
    %114 = vector.extract_strided_slice %110 {offsets = [0, 96], sizes = [8, 32], strides = [1, 1]} : vector<8x128xf32> to vector<8x32xf32>
    %115 = arith.mulf %112, %100 : vector<8x32xf32>
    %116 = arith.mulf %111, %113 : vector<8x32xf32>
    %117 = arith.addf %115, %116 : vector<8x32xf32>
    %118 = math.tanh %117 : vector<8x32xf32>
    %119 = arith.mulf %114, %118 : vector<8x32xf32>
    %120 = vector.extract_strided_slice %71 {offsets = [16, 0], sizes = [8, 128], strides = [1, 1]} : vector<64x128xf32> to vector<8x128xf32>
    %c0_57 = arith.constant 0 : index
    %c0_58 = arith.constant 0 : index
    %121 = vector.load %arg4[%c0_57, %c0_58] : memref<32x128xf32, #tpu.memory_space<vmem>>, vector<32x128xf32>
    %cst_59 = arith.constant dense<0.000000e+00> : vector<8x128xf32>
    %122 = tpu.matmul %119, %121, %cst_59 {dimension_numbers = #tpu.dot_dimension_numbers<[1], [0], [0], [1], [0, 0, 1, 1], [], []>} : vector<8x32xf32>, vector<32x128xf32>, vector<8x128xf32> -> vector<8x128xf32>
    %123 = arith.addf %120, %122 : vector<8x128xf32>
    %124 = arith.mulf %123, %80 : vector<8x128xf32>
    %125 = math.tanh %124 : vector<8x128xf32>
    %126 = arith.mulf %125, %80 : vector<8x128xf32>
    %127 = arith.addf %126, %83 : vector<8x128xf32>
    %128 = vector.extract_strided_slice %127 {offsets = [0, 0], sizes = [8, 32], strides = [1, 1]} : vector<8x128xf32> to vector<8x32xf32>
    %129 = vector.extract_strided_slice %127 {offsets = [0, 32], sizes = [8, 32], strides = [1, 1]} : vector<8x128xf32> to vector<8x32xf32>
    %130 = vector.extract_strided_slice %127 {offsets = [0, 64], sizes = [8, 32], strides = [1, 1]} : vector<8x128xf32> to vector<8x32xf32>
    %131 = vector.extract_strided_slice %127 {offsets = [0, 96], sizes = [8, 32], strides = [1, 1]} : vector<8x128xf32> to vector<8x32xf32>
    %132 = arith.mulf %129, %117 : vector<8x32xf32>
    %133 = arith.mulf %128, %130 : vector<8x32xf32>
    %134 = arith.addf %132, %133 : vector<8x32xf32>
    %135 = math.tanh %134 : vector<8x32xf32>
    %136 = arith.mulf %131, %135 : vector<8x32xf32>
    %137 = vector.extract_strided_slice %71 {offsets = [24, 0], sizes = [8, 128], strides = [1, 1]} : vector<64x128xf32> to vector<8x128xf32>
    %c0_60 = arith.constant 0 : index
    %c0_61 = arith.constant 0 : index
    %138 = vector.load %arg4[%c0_60, %c0_61] : memref<32x128xf32, #tpu.memory_space<vmem>>, vector<32x128xf32>
    %cst_62 = arith.constant dense<0.000000e+00> : vector<8x128xf32>
    %139 = tpu.matmul %136, %138, %cst_62 {dimension_numbers = #tpu.dot_dimension_numbers<[1], [0], [0], [1], [0, 0, 1, 1], [], []>} : vector<8x32xf32>, vector<32x128xf32>, vector<8x128xf32> -> vector<8x128xf32>
    %140 = arith.addf %137, %139 : vector<8x128xf32>
    %141 = arith.mulf %140, %80 : vector<8x128xf32>
    %142 = math.tanh %141 : vector<8x128xf32>
    %143 = arith.mulf %142, %80 : vector<8x128xf32>
    %144 = arith.addf %143, %83 : vector<8x128xf32>
    %145 = vector.extract_strided_slice %144 {offsets = [0, 0], sizes = [8, 32], strides = [1, 1]} : vector<8x128xf32> to vector<8x32xf32>
    %146 = vector.extract_strided_slice %144 {offsets = [0, 32], sizes = [8, 32], strides = [1, 1]} : vector<8x128xf32> to vector<8x32xf32>
    %147 = vector.extract_strided_slice %144 {offsets = [0, 64], sizes = [8, 32], strides = [1, 1]} : vector<8x128xf32> to vector<8x32xf32>
    %148 = vector.extract_strided_slice %144 {offsets = [0, 96], sizes = [8, 32], strides = [1, 1]} : vector<8x128xf32> to vector<8x32xf32>
    %149 = arith.mulf %146, %134 : vector<8x32xf32>
    %150 = arith.mulf %145, %147 : vector<8x32xf32>
    %151 = arith.addf %149, %150 : vector<8x32xf32>
    %152 = math.tanh %151 : vector<8x32xf32>
    %153 = arith.mulf %148, %152 : vector<8x32xf32>
    %154 = vector.extract_strided_slice %71 {offsets = [32, 0], sizes = [8, 128], strides = [1, 1]} : vector<64x128xf32> to vector<8x128xf32>
    %c0_63 = arith.constant 0 : index
    %c0_64 = arith.constant 0 : index
    %155 = vector.load %arg4[%c0_63, %c0_64] : memref<32x128xf32, #tpu.memory_space<vmem>>, vector<32x128xf32>
    %cst_65 = arith.constant dense<0.000000e+00> : vector<8x128xf32>
    %156 = tpu.matmul %153, %155, %cst_65 {dimension_numbers = #tpu.dot_dimension_numbers<[1], [0], [0], [1], [0, 0, 1, 1], [], []>} : vector<8x32xf32>, vector<32x128xf32>, vector<8x128xf32> -> vector<8x128xf32>
    %157 = arith.addf %154, %156 : vector<8x128xf32>
    %158 = arith.mulf %157, %80 : vector<8x128xf32>
    %159 = math.tanh %158 : vector<8x128xf32>
    %160 = arith.mulf %159, %80 : vector<8x128xf32>
    %161 = arith.addf %160, %83 : vector<8x128xf32>
    %162 = vector.extract_strided_slice %161 {offsets = [0, 0], sizes = [8, 32], strides = [1, 1]} : vector<8x128xf32> to vector<8x32xf32>
    %163 = vector.extract_strided_slice %161 {offsets = [0, 32], sizes = [8, 32], strides = [1, 1]} : vector<8x128xf32> to vector<8x32xf32>
    %164 = vector.extract_strided_slice %161 {offsets = [0, 64], sizes = [8, 32], strides = [1, 1]} : vector<8x128xf32> to vector<8x32xf32>
    %165 = vector.extract_strided_slice %161 {offsets = [0, 96], sizes = [8, 32], strides = [1, 1]} : vector<8x128xf32> to vector<8x32xf32>
    %166 = arith.mulf %163, %151 : vector<8x32xf32>
    %167 = arith.mulf %162, %164 : vector<8x32xf32>
    %168 = arith.addf %166, %167 : vector<8x32xf32>
    %169 = math.tanh %168 : vector<8x32xf32>
    %170 = arith.mulf %165, %169 : vector<8x32xf32>
    %171 = vector.extract_strided_slice %71 {offsets = [40, 0], sizes = [8, 128], strides = [1, 1]} : vector<64x128xf32> to vector<8x128xf32>
    %c0_66 = arith.constant 0 : index
    %c0_67 = arith.constant 0 : index
    %172 = vector.load %arg4[%c0_66, %c0_67] : memref<32x128xf32, #tpu.memory_space<vmem>>, vector<32x128xf32>
    %cst_68 = arith.constant dense<0.000000e+00> : vector<8x128xf32>
    %173 = tpu.matmul %170, %172, %cst_68 {dimension_numbers = #tpu.dot_dimension_numbers<[1], [0], [0], [1], [0, 0, 1, 1], [], []>} : vector<8x32xf32>, vector<32x128xf32>, vector<8x128xf32> -> vector<8x128xf32>
    %174 = arith.addf %171, %173 : vector<8x128xf32>
    %175 = arith.mulf %174, %80 : vector<8x128xf32>
    %176 = math.tanh %175 : vector<8x128xf32>
    %177 = arith.mulf %176, %80 : vector<8x128xf32>
    %178 = arith.addf %177, %83 : vector<8x128xf32>
    %179 = vector.extract_strided_slice %178 {offsets = [0, 0], sizes = [8, 32], strides = [1, 1]} : vector<8x128xf32> to vector<8x32xf32>
    %180 = vector.extract_strided_slice %178 {offsets = [0, 32], sizes = [8, 32], strides = [1, 1]} : vector<8x128xf32> to vector<8x32xf32>
    %181 = vector.extract_strided_slice %178 {offsets = [0, 64], sizes = [8, 32], strides = [1, 1]} : vector<8x128xf32> to vector<8x32xf32>
    %182 = vector.extract_strided_slice %178 {offsets = [0, 96], sizes = [8, 32], strides = [1, 1]} : vector<8x128xf32> to vector<8x32xf32>
    %183 = arith.mulf %180, %168 : vector<8x32xf32>
    %184 = arith.mulf %179, %181 : vector<8x32xf32>
    %185 = arith.addf %183, %184 : vector<8x32xf32>
    %186 = math.tanh %185 : vector<8x32xf32>
    %187 = arith.mulf %182, %186 : vector<8x32xf32>
    %188 = vector.extract_strided_slice %71 {offsets = [48, 0], sizes = [8, 128], strides = [1, 1]} : vector<64x128xf32> to vector<8x128xf32>
    %c0_69 = arith.constant 0 : index
    %c0_70 = arith.constant 0 : index
    %189 = vector.load %arg4[%c0_69, %c0_70] : memref<32x128xf32, #tpu.memory_space<vmem>>, vector<32x128xf32>
    %cst_71 = arith.constant dense<0.000000e+00> : vector<8x128xf32>
    %190 = tpu.matmul %187, %189, %cst_71 {dimension_numbers = #tpu.dot_dimension_numbers<[1], [0], [0], [1], [0, 0, 1, 1], [], []>} : vector<8x32xf32>, vector<32x128xf32>, vector<8x128xf32> -> vector<8x128xf32>
    %191 = arith.addf %188, %190 : vector<8x128xf32>
    %192 = arith.mulf %191, %80 : vector<8x128xf32>
    %193 = math.tanh %192 : vector<8x128xf32>
    %194 = arith.mulf %193, %80 : vector<8x128xf32>
    %195 = arith.addf %194, %83 : vector<8x128xf32>
    %196 = vector.extract_strided_slice %195 {offsets = [0, 0], sizes = [8, 32], strides = [1, 1]} : vector<8x128xf32> to vector<8x32xf32>
    %197 = vector.extract_strided_slice %195 {offsets = [0, 32], sizes = [8, 32], strides = [1, 1]} : vector<8x128xf32> to vector<8x32xf32>
    %198 = vector.extract_strided_slice %195 {offsets = [0, 64], sizes = [8, 32], strides = [1, 1]} : vector<8x128xf32> to vector<8x32xf32>
    %199 = vector.extract_strided_slice %195 {offsets = [0, 96], sizes = [8, 32], strides = [1, 1]} : vector<8x128xf32> to vector<8x32xf32>
    %200 = arith.mulf %197, %185 : vector<8x32xf32>
    %201 = arith.mulf %196, %198 : vector<8x32xf32>
    %202 = arith.addf %200, %201 : vector<8x32xf32>
    %203 = math.tanh %202 : vector<8x32xf32>
    %204 = arith.mulf %199, %203 : vector<8x32xf32>
    %205 = vector.extract_strided_slice %71 {offsets = [56, 0], sizes = [8, 128], strides = [1, 1]} : vector<64x128xf32> to vector<8x128xf32>
    %c0_72 = arith.constant 0 : index
    %c0_73 = arith.constant 0 : index
    %206 = vector.load %arg4[%c0_72, %c0_73] : memref<32x128xf32, #tpu.memory_space<vmem>>, vector<32x128xf32>
    %cst_74 = arith.constant dense<0.000000e+00> : vector<8x128xf32>
    %207 = tpu.matmul %204, %206, %cst_74 {dimension_numbers = #tpu.dot_dimension_numbers<[1], [0], [0], [1], [0, 0, 1, 1], [], []>} : vector<8x32xf32>, vector<32x128xf32>, vector<8x128xf32> -> vector<8x128xf32>
    %208 = arith.addf %205, %207 : vector<8x128xf32>
    %209 = arith.mulf %208, %80 : vector<8x128xf32>
    %210 = math.tanh %209 : vector<8x128xf32>
    %211 = arith.mulf %210, %80 : vector<8x128xf32>
    %212 = arith.addf %211, %83 : vector<8x128xf32>
    %213 = vector.extract_strided_slice %212 {offsets = [0, 0], sizes = [8, 32], strides = [1, 1]} : vector<8x128xf32> to vector<8x32xf32>
    %214 = vector.extract_strided_slice %212 {offsets = [0, 32], sizes = [8, 32], strides = [1, 1]} : vector<8x128xf32> to vector<8x32xf32>
    %215 = vector.extract_strided_slice %212 {offsets = [0, 64], sizes = [8, 32], strides = [1, 1]} : vector<8x128xf32> to vector<8x32xf32>
    %216 = vector.extract_strided_slice %212 {offsets = [0, 96], sizes = [8, 32], strides = [1, 1]} : vector<8x128xf32> to vector<8x32xf32>
    %217 = arith.mulf %214, %202 : vector<8x32xf32>
    %218 = arith.mulf %213, %215 : vector<8x32xf32>
    %219 = arith.addf %217, %218 : vector<8x32xf32>
    %220 = math.tanh %219 : vector<8x32xf32>
    %221 = arith.mulf %216, %220 : vector<8x32xf32>
    %c0_75 = arith.constant 0 : index
    %c0_76 = arith.constant 0 : index
    %222 = vector.load %arg6[%c0_75, %c0_76] : memref<32x128xf32, #tpu.memory_space<vmem>>, vector<32x128xf32>
    %cst_77 = arith.constant dense<0.000000e+00> : vector<8x128xf32>
    %223 = tpu.matmul %221, %222, %cst_77 {dimension_numbers = #tpu.dot_dimension_numbers<[1], [0], [0], [1], [0, 0, 1, 1], [], []>} : vector<8x32xf32>, vector<32x128xf32>, vector<8x128xf32> -> vector<8x128xf32>
    %c0_78 = arith.constant 0 : index
    %c0_79 = arith.constant 0 : index
    %224 = vector.load %arg7[%c0_78, %c0_79] : memref<1x128xf32, #tpu.memory_space<vmem>>, vector<1x128xf32>
    %225 = vector.broadcast %224 : vector<1x128xf32> to vector<8x128xf32>
    %226 = arith.addf %223, %225 : vector<8x128xf32>
    %227 = arith.negf %226 : vector<8x128xf32>
    %228 = math.exp %227 : vector<8x128xf32>
    %cst_80 = arith.constant 1.000000e+00 : f32
    %229 = vector.broadcast %cst_80 : f32 to vector<8x128xf32>
    %230 = arith.addf %229, %228 : vector<8x128xf32>
    %231 = arith.divf %229, %230 : vector<8x128xf32>
    %c0_81 = arith.constant 0 : index
    %c0_82 = arith.constant 0 : index
    %232 = vector.load %arg8[%c0_81, %c0_82] : memref<8x128xf32, #tpu.memory_space<vmem>>, vector<8x128xf32>
    tpu.vector_store %arg8[%c0_81, %c0_82], %231 {strides = array<i32>} : memref<8x128xf32, #tpu.memory_space<vmem>>, vector<8x128xf32>,
    return
  }
  func.func @transform_0(%arg0: i32, %arg1: memref<16xi32, #tpu.memory_space<smem>>) -> (i32, i32) {
    %c0_i32 = arith.constant 0 : i32
    %c0_i32_0 = arith.constant 0 : i32
    %c0_i32_1 = arith.constant 0 : i32
    return %c0_i32, %c0_i32_0 : i32, i32
  }
  func.func @transform_1(%arg0: i32, %arg1: memref<16xi32, #tpu.memory_space<smem>>) -> (i32, i32) {
    %c0_i32 = arith.constant 0 : i32
    %c0_i32_0 = arith.constant 0 : i32
    %c0_i32_1 = arith.constant 0 : i32
    return %c0_i32, %c0_i32_0 : i32, i32
  }
  func.func @transform_2(%arg0: i32, %arg1: memref<16xi32, #tpu.memory_space<smem>>) -> (i32, i32) {
    %c0_i32 = arith.constant 0 : i32
    %c0_i32_0 = arith.constant 0 : i32
    %c0_i32_1 = arith.constant 0 : i32
    return %c0_i32, %c0_i32_0 : i32, i32
  }
  func.func @transform_3(%arg0: i32, %arg1: memref<16xi32, #tpu.memory_space<smem>>) -> (i32, i32) {
    %c0_i32 = arith.constant 0 : i32
    %c0_i32_0 = arith.constant 0 : i32
    %c0_i32_1 = arith.constant 0 : i32
    return %c0_i32, %c0_i32_0 : i32, i32
  }
  func.func @transform_4(%arg0: i32, %arg1: memref<16xi32, #tpu.memory_space<smem>>) -> (i32, i32) {
    %c0_i32 = arith.constant 0 : i32
    %c0_i32_0 = arith.constant 0 : i32
    %c0_i32_1 = arith.constant 0 : i32
    return %c0_i32, %c0_i32_0 : i32, i32
  }
  func.func @transform_5(%arg0: i32, %arg1: memref<16xi32, #tpu.memory_space<smem>>) -> (i32, i32) {
    %c0_i32 = arith.constant 0 : i32
    %c0_i32_0 = arith.constant 0 : i32
    %c0_i32_1 = arith.constant 0 : i32
    return %c0_i32, %c0_i32_0 : i32, i32
  }
  func.func @transform_6(%arg0: i32, %arg1: memref<16xi32, #tpu.memory_space<smem>>) -> (i32, i32) {
    %c0_i32 = arith.constant 0 : i32
    %c0_i32_0 = arith.constant 0 : i32
    %c0_i32_1 = arith.constant 0 : i32
    return %c0_i32, %c0_i32_0 : i32, i32
  }
}

</mosaic_0001>

<bundles_post_ra>
// kernel: tpu_custom_call.1
= control target key start
LH: loop header
LB: loop body
LE: loop exit
PB: predicated region body
PF: predicated region fallthrough
CT: control target
= control target key end

     0   :  { %s1877_s0 = inlined_call_operand.vmem [shape: s32[16], index: 0, kind: input, shape index: {}]   ;;  %s1878_s1 = inlined_call_operand.vmem [shape: f32[50,32], index: 1, kind: input, shape index: {}]   ;;  %s1879_s2 = inlined_call_operand.vmem [shape: f32[32,128], index: 2, kind: input, shape index: {}]   ;;  %s1880_s3 = inlined_call_operand.vmem [shape: f32[32,128], index: 3, kind: input, shape index: {}]   ;;  %s1881_s4 = inlined_call_operand.vmem [shape: f32[1,128], index: 4, kind: input, shape index: {}]   ;;  %s1882_s5 = inlined_call_operand.vmem [shape: f32[32,128], index: 5, kind: input, shape index: {}]   ;;  %s1883_s6 = inlined_call_operand.vmem [shape: f32[1,128], index: 6, kind: input, shape index: {}]   ;;  %s1884_s7 = inlined_call_operand.hbm [shape: f32[8,128], index: 7, kind: output, shape index: {}]  }
   0x1   :  { %s12_s26 = sshll.u32 %s1877_s0, 4  ;;  %s13_s26 = int_to_ptr.vmem [resolvable:$true] %s12_s26 }
   0x2   :  { %s1477_s27 = scalar_lea.vmem %s13_s26, 16  ;;  %p1482_p1 = scmp.lt.s32.totalorder %s13_s26, %s13_s26 }
   0x3   :  { %p1478_p0 = scmp.ne.s32.totalorder %s13_s26, %s1477_s27  ;;  %p1483_p2 = scmp.lt.s32.totalorder %s1477_s27, %s1477_s27 }
   0x5   :  { %p1484_p3 = por %p1483_p2, %p1482_p1 }
   0x7   :  { %p1485_p4 = pnand %p1484_p3, %p1478_p0 }
   0x9   :  { %1488 = shalt.err (!%p1485_p4)  }
   0xa   :  { %s1515_s28 = smov [#allocation4]  }
   0xb   :  { %15 = dma.vmem_to_smem %s13_s26, 16, %s1515_s28, [#allocation3] }
   0xc   :  { %1511 = dma.done.wait [#allocation3], 16 }
   0xd   :  { %1512 = vsyncadd [#allocation3], 4294967280 }
   0xe   :  { %17 = sfence }
   0xf   :  { %v113_v0 = vld [vmem:[%s1879_s2] sm:$0xff]  ;;  %v114_v1 = vld [vmem:[%s1879_s2 + $0x8] sm:$0xff]  ;;  %vm31_vm0 = vcmask 261120   ;;  %v1516_v4 = vmov 0.0|0.0   ;;  %v115_v6 = vld [vmem:[%s1879_s2 + $0x10] sm:$0xff]  ;;  %v1517_v8 = vmov 0.0  }
  0x10   :  { %v260_v2 = vld [vmem:[%s1880_s3] sm:$0xff]  ;;  %v1371_v3 = vpack.c.bf16 %v114_v1, %v113_v0  ;;  %1379 = vmatprep.subr.bf16.mxu1 %v1516_v4  ;;  %v261_v5 = vld [vmem:[%s1880_s3 + $0x8] sm:$0xff]  ;;  %v116_v7 = vld [vmem:[%s1879_s2 + $0x18] sm:$0xff]  ;;  %32 = vst.msk [vmem:[#allocation2] sm:$0xff] %vm31_vm0, %v1517_v8  ;;  %s40_s17 = sld [smem:[#allocation4]]  ;;  %s1162_s22 = sld [smem:[#allocation4 + $0x1]] }
  0x11   :  { %33 = vst.msk [vmem:[#allocation2 + $0x8] sm:$0xff] %vm31_vm0, %v1517_v8  ;;  %34 = vst.msk [vmem:[#allocation2 + $0x10] sm:$0xff] %vm31_vm0, %v1517_v8  ;;  %v1601_v9 = vpack.c.bf16 %v261_v5, %v260_v2  ;;  %v1375_v10 = vpack.c.bf16 %v116_v7, %v115_v6  ;;  %s1161_s2 = sld [smem:[#allocation4 + $0x8]]  ;;  %v262_v11 = vld [vmem:[%s1880_s3 + $0x10] sm:$0xff]  ;;  %v263_v12 = vld [vmem:[%s1880_s3 + $0x18] sm:$0xff]  ;;  %s1163_s23 = sld [smem:[#allocation4 + $0x9]] }
  0x12   :  { %35 = vst.msk [vmem:[#allocation2 + $0x18] sm:$0xff] %vm31_vm0, %v1517_v8  ;;  %36 = vst.msk [vmem:[#allocation2 + $0x20] sm:$0xff] %vm31_vm0, %v1517_v8  ;;  %1372 = vmatprep.subr.bf16.mxu0 %v1371_v3 }
  0x13   :  { %37 = vst.msk [vmem:[#allocation2 + $0x28] sm:$0xff] %vm31_vm0, %v1517_v8  ;;  %38 = vst.msk [vmem:[#allocation2 + $0x30] sm:$0xff] %vm31_vm0, %v1517_v8 }
  0x14   :  { %39 = vst.msk [vmem:[#allocation2 + $0x38] sm:$0xff] %vm31_vm0, %v1517_v8 }
  0x15   :  { %18 = vsyncpa [#allocation6], 0  ;;  %1374 = vmatpush3.bf16.msra.mxu0 %v1371_v3  ;;  %1381 = vmatpush3.bf16.msra.mxu1 %v1601_v9  ;;  %v1610_v13 = vpack.c.bf16 %v263_v12, %v262_v11  ;;  %vm43_vm1 = vcmask 253952   ;;  %vm1518_vm2 = vmmov 0   ;;  %v253_v20 = vlaneseq  ;;  %v1650_v24 = vld [vmem:[%s1881_s4] ss:$0 sm:$0xff] }
  0x16   :  { %1376 = vmatprep.subr.bf16.mxu0 %v1375_v10  ;;  %1382 = vmatprep.subr.bf16.mxu1 %v1516_v4  ;;  %s41_s3 = scalar_lea.vmem %s1878_s1, %s40_s17  ;;  %s50_s8 = scalar_lea.vmem %s1878_s1, %s1162_s22  ;;  %v1519_v28 = vmov 0.5  }
  0x17   :  { %1280 = vmatprep.mubr.msk.f32.mxu1 %vm1518_vm2, %v1517_v8  ;;  %v42_v14 = vld [vmem:[%s41_s3] sm:$0x1]  ;;  %s46_s28 = scalar_lea.vmem %s1878_s1, %s1161_s2  ;;  %s54_s10 = scalar_lea.vmem %s1878_s1, %s1163_s23  ;;  %v254_v22 = vand.u32 127, %v253_v20 }
  0x18   :  { %44 = vst.msk [vmem:[#allocation2] sm:$0x1] %vm43_vm1, %v42_v14  ;;  %v47_v15 = vld [vmem:[%s46_s28] sm:$0x1]  ;;  %s1520_s4 = smov 64   ;;  %s1521_s13 = smov 32  }
  0x19   :  { %1378 = vmatpush3.bf16.msra.mxu0 %v1375_v10  ;;  %1384 = vmatpush3.bf16.msra.mxu1 %v1610_v13  ;;  %v51_v16 = vld [vmem:[%s50_s8] sm:$0x1]  ;;  %48 = vst.msk [vmem:[#allocation2 + $0x1] sm:$0x1] %vm43_vm1, %v47_v15  ;;  %vm255_vm3 = vcmp.ge.s32.totalorder %v254_v22, 64  ;;  %vm256_vm4 = vcmp.lt.s32.totalorder %v254_v22, 96 }
  0x1a   :  { %1385 = vmatprep.subr.bf16.mxu1 %v1516_v4  ;;  %1391 = vmatprep.subr.bf16.mxu0 %v1516_v4  ;;  %52 = vst.msk [vmem:[#allocation2 + $0x8] sm:$0x1] %vm43_vm1, %v51_v16  ;;  %v55_v17 = vld [vmem:[%s54_s10] sm:$0x1]  ;;  %vm257_vm5 = vmand %vm255_vm3, %vm256_vm4  ;;  %s1164_s14 = sld [smem:[#allocation4 + $0x2]]  ;;  %s1166_s16 = sld [smem:[#allocation4 + $0x3]] }
  0x1b   :  { %56 = vst.msk [vmem:[#allocation2 + $0x9] sm:$0x1] %vm43_vm1, %v55_v17  ;;  %v1653_v29 = vsel %vm257_vm5, 1.0, %v1519_v28  ;;  %v1656_v33 = vsel %vm257_vm5, 0.0, %v1519_v28  ;;  %s1165_s15 = sld [smem:[#allocation4 + $0xa]]  ;;  %s1167_s17 = sld [smem:[#allocation4 + $0xb]] }
  0x1c   :  { %1281 = vmatmul.mubr.f32.vlgmr.msra.gmra.mrb[0].mxu1 %v1517_v8  ;;  %s1168_s2 = sld [smem:[#allocation4 + $0x4]]  ;;  %s1170_s19 = sld [smem:[#allocation4 + $0x5]] }
  0x1d   :  { %1387 = vmatpush3.bf16.msra.mxu1 %v1601_v9  ;;  %1291 = vmatprep.mubr.msk.f32.mxu1 %vm1518_vm2, %v1517_v8  ;;  %s1169_s18 = sld [smem:[#allocation4 + $0xc]]  ;;  %s1171_s20 = sld [smem:[#allocation4 + $0xd]] }
  0x1e   :  { %1388 = vmatprep.subr.bf16.mxu1 %v1516_v4  ;;  %s1685_s21 = sld [smem:[#allocation4 + $0x6]]  ;;  %s1689_s23 = sld [smem:[#allocation4 + $0x7]] }
  0x1f   :  { %s1687_s22 = sld [smem:[#allocation4 + $0xe]]  ;;  %s1691_s24 = sld [smem:[#allocation4 + $0xf]] }
  0x20   :  { %v105_v18 = vld [vmem:[#allocation2] sm:$0xff]  ;;  %s58_s26 = scalar_lea.vmem %s1878_s1, %s1164_s14  ;;  %s66_s9 = scalar_lea.vmem %s1878_s1, %s1166_s16 }
  0x21   :  { %1390 = vmatpush3.bf16.msra.mxu1 %v1610_v13  ;;  %1260 = vmatprep.mubr.msk.f32.mxu0 %vm31_vm0, %v105_v18  ;;  %s62_s29 = scalar_lea.vmem %s1878_s1, %s1165_s15  ;;  %v59_v58 = vld [vmem:[%s58_s26] sm:$0x1]  ;;  %s70_s11 = scalar_lea.vmem %s1878_s1, %s1167_s17 }
  0x22   :  { %1397 = vmatprep.subr.bf16.mxu1 %v1516_v4  ;;  %v106_v19 = vld [vmem:[#allocation2 + $0x8] sm:$0xff]  ;;  %v63_v59 = vld [vmem:[%s62_s29] sm:$0x1]  ;;  %60 = vst.msk [vmem:[#allocation2 + $0x10] sm:$0x1] %vm43_vm1, %v59_v58  ;;  %s74_s15 = scalar_lea.vmem %s1878_s1, %s1168_s2  ;;  %s82_s27 = scalar_lea.vmem %s1878_s1, %s1170_s19 }
  0x23   :  { %1261 = vmatmul.mubr.msk.f32.vlgmr.msra.gmra.mrb[0].mxu0 %vm31_vm0, %v106_v19  ;;  %64 = vst.msk [vmem:[#allocation2 + $0x11] sm:$0x1] %vm43_vm1, %v63_v59  ;;  %v67_v60 = vld [vmem:[%s66_s9] sm:$0x1]  ;;  %s78_s16 = scalar_lea.vmem %s1878_s1, %s1169_s18  ;;  %s86_s2 = scalar_lea.vmem %s1878_s1, %s1171_s20 }
  0x24   :  { %1393 = vmatpush3.bf16.msra.mxu0 %v1601_v9  ;;  %v71_v61 = vld [vmem:[%s70_s11] sm:$0x1]  ;;  %68 = vst.msk [vmem:[#allocation2 + $0x18] sm:$0x1] %vm43_vm1, %v67_v60  ;;  %s90_s8 = scalar_lea.vmem %s1878_s1, %s1685_s21  ;;  %s98_s11 = scalar_lea.vmem %s1878_s1, %s1689_s23 }
  0x25   :  { %1394 = vmatprep.subr.bf16.mxu0 %v1516_v4  ;;  %72 = vst.msk [vmem:[#allocation2 + $0x19] sm:$0x1] %vm43_vm1, %v71_v61  ;;  %v75_v62 = vld [vmem:[%s74_s15] sm:$0x1]  ;;  %s94_s10 = scalar_lea.vmem %s1878_s1, %s1687_s22  ;;  %s102_s21 = scalar_lea.vmem %s1878_s1, %s1691_s24 }
  0x26   :  { %v79_v63 = vld [vmem:[%s78_s16] sm:$0x1]  ;;  %76 = vst.msk [vmem:[#allocation2 + $0x20] sm:$0x1] %vm43_vm1, %v75_v62 }
  0x27   :  { %80 = vst.msk [vmem:[#allocation2 + $0x21] sm:$0x1] %vm43_vm1, %v79_v63  ;;  %v83_v1 = vld [vmem:[%s82_s27] sm:$0x1] }
  0x28   :  { %1396 = vmatpush3.bf16.msra.mxu0 %v1610_v13  ;;  %v87_v2 = vld [vmem:[%s86_s2] sm:$0x1]  ;;  %84 = vst.msk [vmem:[#allocation2 + $0x28] sm:$0x1] %vm43_vm1, %v83_v1 }
  0x29   :  { %1403 = vmatprep.subr.bf16.mxu0 %v1516_v4  ;;  %88 = vst.msk [vmem:[#allocation2 + $0x29] sm:$0x1] %vm43_vm1, %v87_v2  ;;  %v91_v3 = vld [vmem:[%s90_s8] sm:$0x1] }
  0x2a   :  { %v95_v5 = vld [vmem:[%s94_s10] sm:$0x1]  ;;  %92 = vst.msk [vmem:[#allocation2 + $0x30] sm:$0x1] %vm43_vm1, %v91_v3  ;;  %v107_v10 = vld [vmem:[#allocation2 + $0x10] sm:$0xff] }
  0x2b   :  { %96 = vst.msk [vmem:[#allocation2 + $0x31] sm:$0x1] %vm43_vm1, %v95_v5  ;;  %v99_v6 = vld [vmem:[%s98_s11] sm:$0x1]  ;;  %1263 = vmatprep.mubr.msk.f32.mxu0 %vm31_vm0, %v107_v10 }
  0x2c   :  { %v103_v7 = vld [vmem:[%s102_s21] sm:$0x1]  ;;  %100 = vst.msk [vmem:[#allocation2 + $0x38] sm:$0x1] %vm43_vm1, %v99_v6  ;;  %v108_v11 = vld [vmem:[#allocation2 + $0x18] sm:$0xff] }
  0x2d   :  { %104 = vst.msk [vmem:[#allocation2 + $0x39] sm:$0x1] %vm43_vm1, %v103_v7  ;;  %1264 = vmatmul.mubr.msk.f32.gmra.mrb[2].mxu0 %vm31_vm0, %v108_v11 }
  0x2e   :  { %v109_v12 = vld [vmem:[#allocation2 + $0x20] sm:$0xff] }
  0x2f   :  { %1266 = vmatprep.mubr.msk.f32.mxu0 %vm31_vm0, %v109_v12 }
  0x30   :  { %v110_v14 = vld [vmem:[#allocation2 + $0x28] sm:$0xff] }
  0x31   :  { %1267 = vmatmul.mubr.msk.f32.gmra.mrb[4].mxu0 %vm31_vm0, %v110_v14 }
  0x32   :  { %v111_v15 = vld [vmem:[#allocation2 + $0x30] sm:$0xff] }
  0x33   :  { %1269 = vmatprep.mubr.msk.f32.mxu0 %vm31_vm0, %v111_v15 }
  0x34   :  { %v112_v16 = vld [vmem:[#allocation2 + $0x38] sm:$0xff] }
  0x35   :  { %1270 = vmatmul.mubr.msk.f32.gmra.mrb[6].mxu0 %vm31_vm0, %v112_v16 }
  0x36   :  { %1302 = vmatprep.mubr.msk.f32.mxu0 %vm1518_vm2, %v1517_v8 }
  0xef   :  { %v333_v21 = vpop.f32.mrb[0].mxu1 }
  0xf0   :  { %v1282_v23 = vpop.f32.mrb[1].mxu1 }
  0xf6   :  { %v1262_v25 = vpop.f32.mrb[0].mxu0 }
  0xf7   :  { %v214_v26 = vpop.f32.mrb[1].mxu0  ;;  %v220_v45 = vadd.f32 %v1262_v25, %v1650_v24 }
  0xf8   :  { %v215_v27 = vadd.f32 %v1650_v24, %v214_v26 }
  0xfa   :  { %v337_v30 = vadd.f32 %v333_v21, %v215_v27 }
  0xfc   :  { %v338_v31 = vmul.f32 %v337_v30, %v1653_v29 }
  0xfe   :  { %1441 = vtanh.f32 %v338_v31 }
 0x100   :  { %v1265_v19 = vpop.f32.mrb[2].mxu0 }
 0x101   :  { %v224_v20 = vpop.f32.mrb[3].mxu0 }
 0x102   :  { %v225_v27 = vadd.f32 %v1650_v24, %v224_v20 }
 0x104   :  { %v1756_v21 = vpop.f32.mrb[4].mxu0 }
 0x105   :  { %v1758_v22 = vpop.f32.mrb[5].mxu0  ;;  %v240_v20 = vadd.f32 %v1756_v21, %v1650_v24 }
 0x106   :  { %v235_v63 = vadd.f32 %v1650_v24, %v1758_v22 }
 0x108   :  { %v1442_v32 = vpop.eup %1441  ;;  %v1760_v23 = vpop.f32.mrb[6].mxu0 }
 0x109   :  { %v340_v34 = vmul.f32 %v1442_v32, %v1653_v29  ;;  %v1762_v25 = vpop.f32.mrb[7].mxu0 }
 0x10b   :  { %v341_v35 = vadd.f32 %v340_v34, %v1656_v33 }
 0x10d   :  { %344 = vrot.lane.b32.xlu0 %v341_v35, %s1520_s4  ;;  %v342_v38 = vmul.f32 0.0, %v341_v35 }
 0x17f   :  { %v345_v36 = vpop.permute.xlu0 %344 }
 0x180   :  { %v347_v37 = vmul.f32 %v345_v36, %v341_v35 }
 0x182   :  { %349 = vrot.lane.b32.xlu0 %v347_v37, %s1521_s13 }
 0x1f4   :  { %v350_v39 = vpop.permute.xlu0 %349 }
 0x1f5   :  { %v352_v40 = vadd.f32 %v350_v39, %v342_v38 }
 0x1f7   :  { %1443 = vtanh.f32 %v352_v40 }
 0x201   :  { %v1444_v41 = vpop.eup %1443 }
 0x202   :  { %355 = vrot.lane.b32.xlu1 %v1444_v41, %s1520_s4 }
 0x274   :  { %v356_v42 = vpop.permute.xlu1 %355 }
 0x275   :  { %v358_v43 = vmul.f32 %v356_v42, %v341_v35 }
 0x277   :  { %360 = vrot.lane.b32.xlu1 %v358_v43, %s1521_s13 }
 0x2e9   :  { %v361_v44 = vpop.permute.xlu1 %360 }
 0x2ea   :  { %1292 = vmatmul.mubr.msk.f32.vlgmr.msra.gmra.mrb[2].mxu1 %vm31_vm0, %v361_v44 }
 0x2eb   :  { %1399 = vmatpush3.bf16.msra.mxu1 %v1601_v9  ;;  %1313 = vmatprep.mubr.msk.f32.mxu1 %vm1518_vm2, %v1517_v8 }
 0x2ec   :  { %1400 = vmatprep.subr.bf16.mxu1 %v1516_v4 }
 0x2ef   :  { %1402 = vmatpush3.bf16.msra.mxu1 %v1610_v13 }
 0x2f0   :  { %1409 = vmatprep.subr.bf16.mxu1 %v1516_v4 }
 0x3bd   :  { %v430_v46 = vpop.f32.mrb[2].mxu1 }
 0x3be   :  { %v434_v47 = vadd.f32 %v430_v46, %v220_v45  ;;  %v1293_v48 = vpop.f32.mrb[3].mxu1  ;;  %v230_v46 = vadd.f32 %v1265_v19, %v1650_v24 }
 0x3c0   :  { %v435_v49 = vmul.f32 %v434_v47, %v1653_v29 }
 0x3c2   :  { %1445 = vtanh.f32 %v435_v49 }
 0x3cc   :  { %v1446_v50 = vpop.eup %1445 }
 0x3cd   :  { %v437_v51 = vmul.f32 %v1446_v50, %v1653_v29 }
 0x3cf   :  { %v1675_v52 = vadd.f32 %v437_v51, %v1656_v33 }
 0x3d1   :  { %441 = vrot.lane.b32.xlu0 %v1675_v52, %s1520_s4  ;;  %v439_v55 = vmul.f32 %v1675_v52, %v352_v40 }
 0x443   :  { %v442_v53 = vpop.permute.xlu0 %441 }
 0x444   :  { %v444_v54 = vmul.f32 %v442_v53, %v1675_v52 }
 0x446   :  { %446 = vrot.lane.b32.xlu1 %v444_v54, %s1521_s13 }
 0x4b8   :  { %v447_v56 = vpop.permute.xlu1 %446 }
 0x4b9   :  { %v1682_v57 = vadd.f32 %v447_v56, %v439_v55 }
 0x4bb   :  { %1447 = vtanh.f32 %v1682_v57 }
 0x4c5   :  { %v1448_v0 = vpop.eup %1447 }
 0x4c6   :  { %452 = vrot.lane.b32.xlu0 %v1448_v0, %s1520_s4 }
 0x538   :  { %v453_v17 = vpop.permute.xlu0 %452 }
 0x539   :  { %v455_v18 = vmul.f32 %v453_v17, %v1675_v52 }
 0x53b   :  { %457 = vrot.lane.b32.xlu1 %v455_v18, %s1521_s13 }
 0x5ad   :  { %v458_v26 = vpop.permute.xlu1 %457 }
 0x5ae   :  { %1303 = vmatmul.mubr.msk.f32.vlgmr.msra.gmra.mrb[8].mxu0 %vm31_vm0, %v458_v26 }
 0x5af   :  { %1405 = vmatpush3.bf16.msra.mxu0 %v1601_v9  ;;  %1324 = vmatprep.mubr.msk.f32.mxu0 %vm1518_vm2, %v1517_v8 }
 0x5b0   :  { %1406 = vmatprep.subr.bf16.mxu0 %v1516_v4 }
 0x5b3   :  { %1408 = vmatpush3.bf16.msra.mxu0 %v1610_v13 }
 0x5b4   :  { %1415 = vmatprep.subr.bf16.mxu0 %v1516_v4 }
 0x681   :  { %v527_v28 = vpop.f32.mrb[8].mxu0 }
 0x682   :  { %v531_v30 = vadd.f32 %v527_v28, %v225_v27  ;;  %v1304_v31 = vpop.f32.mrb[9].mxu0 }
 0x684   :  { %v532_v32 = vmul.f32 %v531_v30, %v1653_v29 }
 0x686   :  { %1449 = vtanh.f32 %v532_v32 }
 0x690   :  { %v1450_v34 = vpop.eup %1449 }
 0x691   :  { %v534_v35 = vmul.f32 %v1450_v34, %v1653_v29 }
 0x693   :  { %v535_v36 = vadd.f32 %v534_v35, %v1656_v33 }
 0x695   :  { %538 = vrot.lane.b32.xlu0 %v535_v36, %s1520_s4  ;;  %v536_v39 = vmul.f32 %v535_v36, %v1682_v57 }
 0x707   :  { %v539_v37 = vpop.permute.xlu0 %538 }
 0x708   :  { %v541_v38 = vmul.f32 %v539_v37, %v535_v36 }
 0x70a   :  { %543 = vrot.lane.b32.xlu1 %v541_v38, %s1521_s13 }
 0x77c   :  { %v544_v40 = vpop.permute.xlu1 %543 }
 0x77d   :  { %v546_v41 = vadd.f32 %v544_v40, %v536_v39  ;;  %v245_v40 = vadd.f32 %v1650_v24, %v1762_v25 }
 0x77f   :  { %1451 = vtanh.f32 %v546_v41 }
 0x789   :  { %v1452_v42 = vpop.eup %1451 }
 0x78a   :  { %549 = vrot.lane.b32.xlu0 %v1452_v42, %s1520_s4 }
 0x7fc   :  { %v550_v43 = vpop.permute.xlu0 %549 }
 0x7fd   :  { %v552_v44 = vmul.f32 %v550_v43, %v535_v36 }
 0x7ff   :  { %554 = vrot.lane.b32.xlu1 %v552_v44, %s1521_s13 }
 0x871   :  { %v555_v45 = vpop.permute.xlu1 %554 }
 0x872   :  { %1314 = vmatmul.mubr.msk.f32.vlgmr.msra.gmra.mrb[4].mxu1 %vm31_vm0, %v555_v45 }
 0x873   :  { %1411 = vmatpush3.bf16.msra.mxu1 %v1601_v9  ;;  %1335 = vmatprep.mubr.msk.f32.mxu1 %vm1518_vm2, %v1517_v8 }
 0x874   :  { %1412 = vmatprep.subr.bf16.mxu1 %v1516_v4 }
 0x877   :  { %1414 = vmatpush3.bf16.msra.mxu1 %v1610_v13 }
 0x878   :  { %1421 = vmatprep.subr.bf16.mxu1 %v1516_v4 }
 0x945   :  { %v624_v47 = vpop.f32.mrb[4].mxu1 }
 0x946   :  { %v628_v48 = vadd.f32 %v624_v47, %v230_v46  ;;  %v1315_v49 = vpop.f32.mrb[5].mxu1 }
 0x948   :  { %v629_v50 = vmul.f32 %v628_v48, %v1653_v29 }
 0x94a   :  { %1453 = vtanh.f32 %v629_v50 }
 0x954   :  { %v1454_v51 = vpop.eup %1453 }
 0x955   :  { %v631_v52 = vmul.f32 %v1454_v51, %v1653_v29 }
 0x957   :  { %v632_v53 = vadd.f32 %v631_v52, %v1656_v33 }
 0x959   :  { %635 = vrot.lane.b32.xlu0 %v632_v53, %s1520_s4  ;;  %v633_v56 = vmul.f32 %v632_v53, %v546_v41 }
 0x9cb   :  { %v636_v54 = vpop.permute.xlu0 %635 }
 0x9cc   :  { %v638_v55 = vmul.f32 %v636_v54, %v632_v53 }
 0x9ce   :  { %640 = vrot.lane.b32.xlu1 %v638_v55, %s1521_s13  ;;  %v250_v55 = vadd.f32 %v1760_v23, %v1650_v24  ;;  %v1038_v23 = vld [vmem:[%s1882_s5] sm:$0xff] }
 0xa40   :  { %v641_v57 = vpop.permute.xlu1 %640 }
 0xa41   :  { %v643_v58 = vadd.f32 %v641_v57, %v633_v56 }
 0xa43   :  { %1455 = vtanh.f32 %v643_v58 }
 0xa4d   :  { %v1456_v59 = vpop.eup %1455 }
 0xa4e   :  { %646 = vrot.lane.b32.xlu0 %v1456_v59, %s1520_s4 }
 0xac0   :  { %v647_v60 = vpop.permute.xlu0 %646 }
 0xac1   :  { %v649_v61 = vmul.f32 %v647_v60, %v632_v53 }
 0xac3   :  { %651 = vrot.lane.b32.xlu1 %v649_v61, %s1521_s13 }
 0xb35   :  { %v652_v62 = vpop.permute.xlu1 %651 }
 0xb36   :  { %1325 = vmatmul.mubr.msk.f32.vlgmr.msra.gmra.mrb[10].mxu0 %vm31_vm0, %v652_v62 }
 0xb37   :  { %1417 = vmatpush3.bf16.msra.mxu0 %v1601_v9  ;;  %1346 = vmatprep.mubr.msk.f32.mxu0 %vm1518_vm2, %v1517_v8 }
 0xb38   :  { %1418 = vmatprep.subr.bf16.mxu0 %v1516_v4 }
 0xb3b   :  { %1420 = vmatpush3.bf16.msra.mxu0 %v1610_v13 }
 0xb3c   :  { %1427 = vmatprep.subr.bf16.mxu0 %v1516_v4 }
 0xc09   :  { %v721_v0 = vpop.f32.mrb[10].mxu0 }
 0xc0a   :  { %v725_v1 = vadd.f32 %v721_v0, %v235_v63  ;;  %v1326_v2 = vpop.f32.mrb[11].mxu0 }
 0xc0c   :  { %v726_v3 = vmul.f32 %v725_v1, %v1653_v29 }
 0xc0e   :  { %1457 = vtanh.f32 %v726_v3 }
 0xc18   :  { %v1458_v5 = vpop.eup %1457 }
 0xc19   :  { %v728_v6 = vmul.f32 %v1458_v5, %v1653_v29  ;;  %v1041_v5 = vld [vmem:[%s1882_s5 + $0x18] sm:$0xff] }
 0xc1b   :  { %v729_v7 = vadd.f32 %v728_v6, %v1656_v33 }
 0xc1d   :  { %732 = vrot.lane.b32.xlu0 %v729_v7, %s1520_s4  ;;  %v730_v12 = vmul.f32 %v729_v7, %v643_v58 }
 0xc8f   :  { %v733_v10 = vpop.permute.xlu0 %732 }
 0xc90   :  { %v735_v11 = vmul.f32 %v733_v10, %v729_v7 }
 0xc92   :  { %737 = vrot.lane.b32.xlu1 %v735_v11, %s1521_s13 }
 0xd04   :  { %v738_v14 = vpop.permute.xlu1 %737 }
 0xd05   :  { %v740_v15 = vadd.f32 %v738_v14, %v730_v12  ;;  %v1192_v14 = vld [vmem:[%s1883_s6] ss:$0 sm:$0xff] }
 0xd07   :  { %1459 = vtanh.f32 %v740_v15 }
 0xd11   :  { %v1460_v16 = vpop.eup %1459 }
 0xd12   :  { %743 = vrot.lane.b32.xlu0 %v1460_v16, %s1520_s4 }
 0xd84   :  { %v744_v17 = vpop.permute.xlu0 %743 }
 0xd85   :  { %v746_v18 = vmul.f32 %v744_v17, %v729_v7 }
 0xd87   :  { %748 = vrot.lane.b32.xlu1 %v746_v18, %s1521_s13 }
 0xdf9   :  { %v749_v19 = vpop.permute.xlu1 %748 }
 0xdfa   :  { %1336 = vmatmul.mubr.msk.f32.vlgmr.msra.gmra.mrb[6].mxu1 %vm31_vm0, %v749_v19 }
 0xdfb   :  { %1423 = vmatpush3.bf16.msra.mxu1 %v1601_v9  ;;  %1357 = vmatprep.mubr.msk.f32.mxu1 %vm1518_vm2, %v1517_v8 }
 0xdfc   :  { %1424 = vmatprep.subr.bf16.mxu1 %v1516_v4 }
 0xdff   :  { %1426 = vmatpush3.bf16.msra.mxu1 %v1610_v13 }
 0xecd   :  { %v818_v22 = vpop.f32.mrb[6].mxu1 }
 0xece   :  { %v822_v26 = vadd.f32 %v818_v22, %v240_v20  ;;  %v1337_v27 = vpop.f32.mrb[7].mxu1 }
 0xed0   :  { %v823_v28 = vmul.f32 %v822_v26, %v1653_v29 }
 0xed2   :  { %1461 = vtanh.f32 %v823_v28 }
 0xedc   :  { %v1462_v30 = vpop.eup %1461 }
 0xedd   :  { %v825_v31 = vmul.f32 %v1462_v30, %v1653_v29 }
 0xedf   :  { %v826_v9 = vadd.f32 %v825_v31, %v1656_v33 }
 0xee1   :  { %829 = vrot.lane.b32.xlu0 %v826_v9, %s1520_s4  ;;  %v827_v13 = vmul.f32 %v826_v9, %v740_v15 }
 0xf53   :  { %v830_v32 = vpop.permute.xlu0 %829 }
 0xf54   :  { %v832_v34 = vmul.f32 %v830_v32, %v826_v9 }
 0xf56   :  { %834 = vrot.lane.b32.xlu1 %v832_v34, %s1521_s13 }
 0xfc8   :  { %v835_v35 = vpop.permute.xlu1 %834 }
 0xfc9   :  { %v837_v21 = vadd.f32 %v835_v35, %v827_v13 }
 0xfcb   :  { %1463 = vtanh.f32 %v837_v21 }
 0xfd5   :  { %v1464_v36 = vpop.eup %1463 }
 0xfd6   :  { %840 = vrot.lane.b32.xlu0 %v1464_v36, %s1520_s4 }
0x1048   :  { %v841_v37 = vpop.permute.xlu0 %840 }
0x1049   :  { %v843_v38 = vmul.f32 %v841_v37, %v826_v9 }
0x104b   :  { %845 = vrot.lane.b32.xlu1 %v843_v38, %s1521_s13 }
0x10bd   :  { %v846_v39 = vpop.permute.xlu1 %845 }
0x10be   :  { %1347 = vmatmul.mubr.msk.f32.vlgmr.msra.gmra.mrb[12].mxu0 %vm31_vm0, %v846_v39 }
0x10bf   :  { %1368 = vmatprep.mubr.msk.f32.mxu0 %vm1518_vm2, %v1517_v8 }
0x1191   :  { %v915_v41 = vpop.f32.mrb[12].mxu0 }
0x1192   :  { %v919_v42 = vadd.f32 %v915_v41, %v245_v40  ;;  %v1348_v43 = vpop.f32.mrb[13].mxu0 }
0x1194   :  { %v920_v44 = vmul.f32 %v919_v42, %v1653_v29 }
0x1196   :  { %1465 = vtanh.f32 %v920_v44 }
0x11a0   :  { %v1466_v45 = vpop.eup %1465 }
0x11a1   :  { %v922_v46 = vmul.f32 %v1466_v45, %v1653_v29 }
0x11a3   :  { %v923_v47 = vadd.f32 %v922_v46, %v1656_v33 }
0x11a5   :  { %926 = vrot.lane.b32.xlu0 %v923_v47, %s1520_s4  ;;  %v924_v8 = vmul.f32 %v923_v47, %v837_v21 }
0x1217   :  { %v927_v48 = vpop.permute.xlu0 %926 }
0x1218   :  { %v929_v49 = vmul.f32 %v927_v48, %v923_v47 }
0x121a   :  { %931 = vrot.lane.b32.xlu1 %v929_v49, %s1521_s13 }
0x128c   :  { %v932_v50 = vpop.permute.xlu1 %931 }
0x128d   :  { %v934_v25 = vadd.f32 %v932_v50, %v924_v8 }
0x128f   :  { %1467 = vtanh.f32 %v934_v25 }
0x1299   :  { %v1468_v51 = vpop.eup %1467 }
0x129a   :  { %937 = vrot.lane.b32.xlu0 %v1468_v51, %s1520_s4 }
0x130c   :  { %v938_v52 = vpop.permute.xlu0 %937 }
0x130d   :  { %v940_v53 = vmul.f32 %v938_v52, %v923_v47 }
0x130f   :  { %942 = vrot.lane.b32.xlu1 %v940_v53, %s1521_s13 }
0x1381   :  { %v943_v54 = vpop.permute.xlu1 %942 }
0x1382   :  { %1358 = vmatmul.mubr.msk.f32.vlgmr.msra.gmra.mrb[8].mxu1 %vm31_vm0, %v943_v54 }
0x1455   :  { %v1012_v56 = vpop.f32.mrb[8].mxu1 }
0x1456   :  { %v1016_v57 = vadd.f32 %v1012_v56, %v250_v55  ;;  %v1359_v58 = vpop.f32.mrb[9].mxu1 }
0x1458   :  { %v1017_v59 = vmul.f32 %v1016_v57, %v1653_v29 }
0x145a   :  { %1469 = vtanh.f32 %v1017_v59 }
0x1464   :  { %v1470_v60 = vpop.eup %1469 }
0x1465   :  { %v1019_v61 = vmul.f32 %v1470_v60, %v1653_v29  ;;  %v1039_v29 = vld [vmem:[%s1882_s5 + $0x8] sm:$0xff] }
0x1466   :  { %v1428_v3 = vpack.c.bf16 %v1039_v29, %v1038_v23 }
0x1467   :  { %v1020_v62 = vadd.f32 %v1019_v61, %v1656_v33  ;;  %v1040_v33 = vld [vmem:[%s1882_s5 + $0x10] sm:$0xff]  ;;  %s1522_s5 = smov [#allocation5]  }
0x1468   :  { %1429 = vmatpush3.bf16.msra.mxu0 %v1428_v3  ;;  %v1431_v6 = vpack.c.bf16 %v1041_v5, %v1040_v33 }
0x1469   :  { %1023 = vrot.lane.b32.xlu0 %v1020_v62, %s1520_s4  ;;  %v1021_v1 = vmul.f32 %v1020_v62, %v934_v25  ;;  %1430 = vmatprep.subr.bf16.mxu0 %v1516_v4 }
0x146c   :  { %1432 = vmatpush3.bf16.msra.mxu0 %v1431_v6 }
0x14db   :  { %v1024_v63 = vpop.permute.xlu0 %1023 }
0x14dc   :  { %v1026_v0 = vmul.f32 %v1024_v63, %v1020_v62 }
0x14de   :  { %1028 = vrot.lane.b32.xlu1 %v1026_v0, %s1521_s13 }
0x1550   :  { %v1029_v2 = vpop.permute.xlu1 %1028 }
0x1551   :  { %v1031_v24 = vadd.f32 %v1029_v2, %v1021_v1 }
0x1553   :  { %1471 = vtanh.f32 %v1031_v24 }
0x155d   :  { %v1472_v7 = vpop.eup %1471 }
0x155e   :  { %1034 = vrot.lane.b32.xlu0 %v1472_v7, %s1520_s4  ;;  %s1137_s4 = sshll.u32 %s1522_s5, 4  ;;  %s1138_s4 = int_to_ptr.vmem [resolvable:$true] %s1137_s4 }
0x155f   :  { %p1494_p6 = scmp.lt.s32.totalorder %s1138_s4, %s1138_s4 }
0x15d0   :  { %v1035_v10 = vpop.permute.xlu0 %1034 }
0x15d1   :  { %v1037_v11 = vmul.f32 %v1035_v10, %v1020_v62 }
0x15d3   :  { %1050 = vrot.lane.b32.xlu1 %v1037_v11, %s1521_s13  ;;  %s1489_s13 = scalar_lea.vmem %s1138_s4, 128 }
0x15d4   :  { %p1490_p5 = scmp.ne.s32.totalorder %s1138_s4, %s1489_s13  ;;  %p1495_p7 = scmp.lt.s32.totalorder %s1489_s13, %s1489_s13 }
0x15d6   :  { %p1496_p8 = por %p1495_p7, %p1494_p6 }
0x15d8   :  { %p1497_p9 = pnand %p1496_p8, %p1490_p5 }
0x1645   :  { %v1051_v12 = vpop.permute.xlu1 %1050 }
0x1646   :  { %1369 = vmatmul.mubr.msk.f32.vlgmr.msra.gmra.mrb[14].mxu0 %vm31_vm0, %v1051_v12 }
0x1719   :  { %v1120_v15 = vpop.f32.mrb[14].mxu0 }
0x171a   :  { %v1121_v16 = vadd.f32 %v1192_v14, %v1120_v15  ;;  %v1370_v17 = vpop.f32.mrb[15].mxu0 }
0x171c   :  { %v1194_v18 = vmul.f32 -1.442695, %v1121_v16 }
0x171e   :  { %1473 = vpow2.f32 %v1194_v18 }
0x1728   :  { %v1474_v4 = vpop.eup %1473 }
0x1729   :  { %v1127_v19 = vadd.f32 1.0, %v1474_v4 }
0x172b   :  { %1475 = vrcp.f32 %v1127_v19 }
0x1735   :  { %v1476_v20 = vpop.eup %1475 }
0x1736   :  { %1130 = vst [vmem:[#allocation5] sm:$0xff] %v1476_v20 }
0x1737   :  { %1500 = shalt.err (!%p1497_p9)
}
0x1738   :  { %s1501_s28 = scalar_lea.hbm %s1884_s7, 128 }
0x1739   :  { %p1502_p10 = scmp.ne.s32.totalorder %s1884_s7, %s1501_s28  ;;  %p1505_p11 = scmp.lt.u32.totalorder %s1501_s28, %s1884_s7 }
0x173b   :  { %p1507_p12 = pnand %p1505_p11, %p1502_p10 }
0x173d   :  { %1510 = shalt.err (!%p1507_p12)
}
0x173e   :  { %1140 = dma.vmem_to_hbm [thread:$0]  %s1138_s4, 128, %s1884_s7, [#allocation6]  }
0x173f   :  { %1513 = dma.done.wait [#allocation6], 128  }
0x1740   :  { %1514 = vsyncadd [#allocation6], 4294967168 }
0x1741   :  { %1144 = vsyncpa [#allocation6], 1 }

</bundles_post_ra>
